<compile_context>
chip_gen: v6e
topology: v6e:2x2x1
jax: 0.10.0
libtpu: 0.0.40
codegen_flags: <defaults>
</compile_context>

<pallas_src>
import jax
import jax.numpy as jnp
from jax.experimental import pallas as pl
from jax.experimental.pallas import tpu as pltpu


def _round_up(x, m):
    return ((x + m - 1) // m) * m


def _pick_batch_block(B, T, target_rows=256):
    """Largest divisor Bb of B with Bb*T <= target_rows (feed the MXU rows)."""
    bb = 1
    for cand in range(1, B + 1):
        if B % cand == 0 and cand * T <= target_rows:
            bb = cand
    return bb


def make_generator_kernel(Bb, T, D, V, Vpad, Vaug, S, Vep, inv_temp):
    def kernel(x_ref, bias_ref, attn_ref, idx_ref, w_ref, out_ref):
        # ---- fused projection on the MXU: cols [0:V] -> vocab logits,
        #      col Vpad -> p_gen.  M = Bb*T rows per grid step. ----
        x2 = x_ref[...].reshape(Bb * T, D)
        full = jnp.dot(x2, w_ref[...], preferred_element_type=jnp.float32)
        full = full.reshape(Bb, T, Vaug) + bias_ref[...]           # (Bb, T, Vaug)

        alpha = jax.nn.sigmoid(full[:, :, Vpad:Vpad + 1])          # (Bb, T, 1)

        # ---- vocab softmax with alpha folded into the normalisation ----
        lt = full[:, :, :Vpad] * inv_temp
        if Vpad > V:  # mask vocab padding columns out of the softmax
            col = jax.lax.broadcasted_iota(jnp.int32, (Bb, T, Vpad), 2)
            lt = jnp.where(col < V, lt, -1e30)
        lmax = jnp.max(lt, axis=-1, keepdims=True)
        lexp = jnp.exp(lt - lmax)
        lsum = jnp.sum(lexp, axis=-1, keepdims=True)
        vocab_dist_ = lexp * (alpha / lsum)                        # (Bb, T, Vpad)

        # ---- attention softmax, (1-alpha) folded into the normalisation ----
        a = attn_ref[...] * inv_temp                               # (Bb, T, S)
        amax = jnp.max(a, axis=-1, keepdims=True)
        aexp = jnp.exp(a - amax)
        asum = jnp.sum(aexp, axis=-1, keepdims=True)
        attn_ = aexp * ((1.0 - alpha) / asum)                      # (Bb, T, S)

        # ---- scatter_add over the extended vocab via one-hot matmul ----
        ids = idx_ref[...]                                         # (Bb, 1, S) lane-dense
        one_hot_t = (ids == jax.lax.broadcasted_iota(
            jnp.int32, (Bb, Vep, S), 1)).astype(jnp.float32)       # (Bb, Vep, S)
        scattered = jnp.einsum('bts,bvs->btv', attn_, one_hot_t,
                               preferred_element_type=jnp.float32)  # (Bb, T, Vep)

        # ---- split store (no concat with zeros); padded cols sliced off in
        #      the wrapper (they hold log(1e-18)). ----
        out_ref[:, :, :V] = jnp.log(vocab_dist_[:, :, :V]
                                    + scattered[:, :, :V] + 1e-18)
        if Vep > V:
            out_ref[:, :, V:] = jnp.log(scattered[:, :, V:] + 1e-18)

    return kernel


def generator_forward(x, pred_emotion, attn_dist, enc_batch_extend_vocab,
                      params, *, n_extra, temp=1.0):
    B, T, D = x.shape
    S = attn_dist.shape[-1]
    V = params["we"].shape[1]
    E = n_extra
    Ve = V + E

    Vpad = _round_up(V, 128)       # vocab logit width inside the kernel
    Vaug = Vpad + 128              # + lane-aligned group holding the p_gen column
    Vep = _round_up(Ve, 128)       # padded extended-vocab output width

    we = params["we"]                          # (2D, V)
    be = params["be"].reshape(1, V)            # (1, V)
    wp = params["wp"]                          # (D, 1)
    bp = params["bp"][0]                       # scalar

    # Hoisted pred_emotion projection: one efficient (B,D)x(D,V) XLA matmul.
    pe_logit = pred_emotion[:, 0, :] @ we[D:, :] + be              # (B, V)

    # Augmented weight: [ we[:D] | 0-pad | wp | 0-pad ].
    w_aug = jnp.zeros((D, Vaug), jnp.float32)
    w_aug = w_aug.at[:, :V].set(we[:D, :])
    w_aug = w_aug.at[:, Vpad].set(wp[:, 0])

    # Augmented per-batch bias: [ pe_logit | 0 | bp | 0 ].
    bias_aug = jnp.zeros((B, 1, Vaug), jnp.float32)
    bias_aug = bias_aug.at[:, 0, :V].set(pe_logit)
    bias_aug = bias_aug.at[:, 0, Vpad].set(bp)

    # Lane-dense indices (B, 1, S).
    idx = enc_batch_extend_vocab.astype(jnp.int32)[:, None, :]

    Bb = _pick_batch_block(B, T)
    grid = (B // Bb,)

    kernel = make_generator_kernel(Bb, T, D, V, Vpad, Vaug, S, Vep,
                                   float(1.0 / temp))

    out_padded = pl.pallas_call(
        kernel,
        out_shape=jax.ShapeDtypeStruct((B, T, Vep), jnp.float32),
        grid=grid,
        in_specs=[
            pl.BlockSpec((Bb, T, D), lambda b: (b, 0, 0)),      # x
            pl.BlockSpec((Bb, 1, Vaug), lambda b: (b, 0, 0)),   # per-batch bias
            pl.BlockSpec((Bb, T, S), lambda b: (b, 0, 0)),      # attn_dist
            pl.BlockSpec((Bb, 1, S), lambda b: (b, 0, 0)),      # extend-vocab ids
            pl.BlockSpec((D, Vaug), lambda b: (0, 0)),          # fused weight (grid-invariant)
        ],
        out_specs=pl.BlockSpec((Bb, T, Vep), lambda b: (b, 0, 0)),
        compiler_params=pltpu.CompilerParams(
            dimension_semantics=("parallel",),      # independent batch blocks
            vmem_limit_bytes=64 * 1024 * 1024),
    )(x, bias_aug, attn_dist, idx, w_aug)

    return out_padded[:, :, :Ve]


def generator_reference(x, pred_emotion, attn_dist, enc_batch_extend_vocab,
                        params, *, n_extra, temp=1.0):
    """Pure-JAX replica of the PyTorch forward (pointer_gen path)."""
    B, T, D = x.shape
    S = attn_dist.shape[-1]
    V = params["we"].shape[1]

    p_gen = x @ params["wp"] + params["bp"]            # (B, T, 1)
    alpha = jax.nn.sigmoid(p_gen)

    pe = jnp.broadcast_to(pred_emotion, (B, T, D))
    xc = jnp.concatenate([x, pe], axis=2)              # (B, T, 2D)
    logit = xc @ params["we"] + params["be"]           # (B, T, V)

    vocab_dist = jax.nn.softmax(logit / temp, axis=2)
    vocab_dist_ = alpha * vocab_dist
    attn = jax.nn.softmax(attn_dist / temp, axis=-1)
    attn_ = (1.0 - alpha) * attn

    vocab_ext = jnp.concatenate(
        [vocab_dist_, jnp.zeros((B, T, n_extra), jnp.float32)], axis=2)

    def scatter_one(vd, ids, upd):                     # vd (Ve,), ids (S,), upd (S,)
        return vd.at[ids].add(upd)

    scattered = jax.vmap(jax.vmap(scatter_one, in_axes=(0, None, 0)),
                         in_axes=(0, 0, 0))(vocab_ext,
                                            enc_batch_extend_vocab.astype(jnp.int32),
                                            attn_)
    return jnp.log(scattered + 1e-18)


if __name__ == "__main__":
    # batch, seq, d_model(=hidden_dim), vocab, src_len, extra_zeros
    B, T, D, V, S, E = 2, 8, 32, 128, 16, 16

    key = jax.random.PRNGKey(0)
    keys = jax.random.split(key, 8)

    x = jax.random.normal(keys[0], (B, T, D), jnp.float32)
    pred_emotion = jax.random.normal(keys[1], (B, 1, D), jnp.float32)
    attn_dist = jax.random.normal(keys[2], (B, T, S), jnp.float32)
    enc_batch_extend_vocab = jax.random.randint(keys[3], (B, S), 0, V + E, jnp.int32)

    params = {
        "wp": 0.1 * jax.random.normal(keys[4], (D, 1), jnp.float32),       # p_gen_linear
        "bp": jnp.zeros((1,), jnp.float32),
        "we": 0.05 * jax.random.normal(keys[5], (2 * D, V), jnp.float32),  # emo_proj
        "be": 0.01 * jax.random.normal(keys[6], (V,), jnp.float32),
    }
    # TODO(synk): non-pointer_gen branch (plain proj + log_softmax) not exercised;
    # it is a strict subset of this kernel's compute.

    out = generator_forward(x, pred_emotion, attn_dist, enc_batch_extend_vocab,
                            params, n_extra=E, temp=1.0)
    out = jax.block_until_ready(out)

    ref = generator_reference(x, pred_emotion, attn_dist, enc_batch_extend_vocab,
                              params, n_extra=E, temp=1.0)
    assert out.shape == (B, T, V + E)
    assert jnp.allclose(out, ref, atol=1e-4, rtol=1e-4), "mismatch vs reference"

    print("KERNEL_OK")
</pallas_src>

<mosaic_0001>
module attributes {stable_mosaic.version = 11 : i64} {
  func.func @kernel(%arg0: i32, %arg1: memref<2x8x32xf32, #tpu.memory_space<vmem>>, %arg2: memref<2x1x256xf32, #tpu.memory_space<vmem>>, %arg3: memref<2x8x16xf32, #tpu.memory_space<vmem>>, %arg4: memref<2x1x16xi32, #tpu.memory_space<vmem>>, %arg5: memref<32x256xf32, #tpu.memory_space<vmem>>, %arg6: memref<2x8x256xf32, #tpu.memory_space<vmem>>) attributes {dimension_semantics = [#tpu.dimension_semantics<parallel>], iteration_bounds = array<i64: 1>, scalar_prefetch = 0 : i64, scratch_operands = 0 : i64, tpu.core_type = #tpu.core_type<tc>, window_params = [{transform_indices = @transform_0, window_bounds = array<i64: 2, 8, 32>}, {transform_indices = @transform_1, window_bounds = array<i64: 2, 1, 256>}, {transform_indices = @transform_2, window_bounds = array<i64: 2, 8, 16>}, {transform_indices = @transform_3, window_bounds = array<i64: 2, 1, 16>}, {pipeline_mode = #tpu.pipeline_mode<synchronous>, transform_indices = @transform_4, window_bounds = array<i64: 32, 256>}, {transform_indices = @transform_5, window_bounds = array<i64: 2, 8, 256>}]} {
    %c0 = arith.constant 0 : index
    %c0_0 = arith.constant 0 : index
    %c0_1 = arith.constant 0 : index
    %0 = vector.load %arg1[%c0, %c0_0, %c0_1] : memref<2x8x32xf32, #tpu.memory_space<vmem>>, vector<2x8x32xf32>
    %1 = vector.shape_cast %0 : vector<2x8x32xf32> to vector<16x32xf32>
    %c0_2 = arith.constant 0 : index
    %c0_3 = arith.constant 0 : index
    %2 = vector.load %arg5[%c0_2, %c0_3] : memref<32x256xf32, #tpu.memory_space<vmem>>, vector<32x256xf32>
    %cst = arith.constant dense<0.000000e+00> : vector<16x256xf32>
    %3 = tpu.matmul %1, %2, %cst {dimension_numbers = #tpu.dot_dimension_numbers<[1], [0], [0], [1], [0, 0, 1, 1], [], []>} : vector<16x32xf32>, vector<32x256xf32>, vector<16x256xf32> -> vector<16x256xf32>
    %4 = vector.shape_cast %3 : vector<16x256xf32> to vector<2x8x256xf32>
    %c0_4 = arith.constant 0 : index
    %c0_5 = arith.constant 0 : index
    %c0_6 = arith.constant 0 : index
    %5 = vector.load %arg2[%c0_4, %c0_5, %c0_6] : memref<2x1x256xf32, #tpu.memory_space<vmem>>, vector<2x1x256xf32>
    %6 = vector.broadcast %5 : vector<2x1x256xf32> to vector<2x8x256xf32>
    %7 = arith.addf %4, %6 : vector<2x8x256xf32>
    %8 = vector.extract_strided_slice %7 {offsets = [0, 0, 128], sizes = [2, 8, 1], strides = [1, 1, 1]} : vector<2x8x256xf32> to vector<2x8x1xf32>
    %9 = arith.negf %8 : vector<2x8x1xf32>
    %10 = math.exp %9 : vector<2x8x1xf32>
    %cst_7 = arith.constant 1.000000e+00 : f32
    %11 = vector.broadcast %cst_7 : f32 to vector<2x8x1xf32>
    %12 = arith.addf %11, %10 : vector<2x8x1xf32>
    %13 = arith.divf %11, %12 : vector<2x8x1xf32>
    %14 = vector.extract_strided_slice %7 {offsets = [0, 0, 0], sizes = [2, 8, 128], strides = [1, 1, 1]} : vector<2x8x256xf32> to vector<2x8x128xf32>
    %cst_8 = arith.constant 1.000000e+00 : f32
    %15 = vector.broadcast %cst_8 : f32 to vector<2x8x128xf32>
    %16 = arith.mulf %14, %15 : vector<2x8x128xf32>
    %cst_9 = arith.constant dense<0xFF800000> : vector<2x8xf32>
    %17 = vector.multi_reduction <maximumf>, %16, %cst_9 [2] : vector<2x8x128xf32> to vector<2x8xf32>
    %18 = vector.shape_cast %17 : vector<2x8xf32> to vector<2x8x1xf32>
    %19 = vector.broadcast %18 : vector<2x8x1xf32> to vector<2x8x128xf32>
    %20 = arith.subf %16, %19 : vector<2x8x128xf32>
    %21 = math.exp %20 : vector<2x8x128xf32>
    %cst_10 = arith.constant dense<0.000000e+00> : vector<2x8xf32>
    %22 = vector.multi_reduction <add>, %21, %cst_10 [2] : vector<2x8x128xf32> to vector<2x8xf32>
    %23 = vector.shape_cast %22 : vector<2x8xf32> to vector<2x8x1xf32>
    %24 = arith.divf %13, %23 : vector<2x8x1xf32>
    %25 = vector.broadcast %24 : vector<2x8x1xf32> to vector<2x8x128xf32>
    %26 = arith.mulf %21, %25 : vector<2x8x128xf32>
    %c0_11 = arith.constant 0 : index
    %c0_12 = arith.constant 0 : index
    %c0_13 = arith.constant 0 : index
    %27 = vector.load %arg3[%c0_11, %c0_12, %c0_13] : memref<2x8x16xf32, #tpu.memory_space<vmem>>, vector<2x8x16xf32>
    %cst_14 = arith.constant 1.000000e+00 : f32
    %28 = vector.broadcast %cst_14 : f32 to vector<2x8x16xf32>
    %29 = arith.mulf %27, %28 : vector<2x8x16xf32>
    %cst_15 = arith.constant dense<0xFF800000> : vector<2x8xf32>
    %30 = vector.multi_reduction <maximumf>, %29, %cst_15 [2] : vector<2x8x16xf32> to vector<2x8xf32>
    %31 = vector.shape_cast %30 : vector<2x8xf32> to vector<2x8x1xf32>
    %32 = vector.broadcast %31 : vector<2x8x1xf32> to vector<2x8x16xf32>
    %33 = arith.subf %29, %32 : vector<2x8x16xf32>
    %34 = math.exp %33 : vector<2x8x16xf32>
    %cst_16 = arith.constant dense<0.000000e+00> : vector<2x8xf32>
    %35 = vector.multi_reduction <add>, %34, %cst_16 [2] : vector<2x8x16xf32> to vector<2x8xf32>
    %36 = vector.shape_cast %35 : vector<2x8xf32> to vector<2x8x1xf32>
    %cst_17 = arith.constant 1.000000e+00 : f32
    %37 = vector.broadcast %cst_17 : f32 to vector<2x8x1xf32>
    %38 = arith.subf %37, %13 : vector<2x8x1xf32>
    %39 = arith.divf %38, %36 : vector<2x8x1xf32>
    %40 = vector.broadcast %39 : vector<2x8x1xf32> to vector<2x8x16xf32>
    %41 = arith.mulf %34, %40 : vector<2x8x16xf32>
    %c0_18 = arith.constant 0 : index
    %c0_19 = arith.constant 0 : index
    %c0_20 = arith.constant 0 : index
    %42 = vector.load %arg4[%c0_18, %c0_19, %c0_20] : memref<2x1x16xi32, #tpu.memory_space<vmem>>, vector<2x1x16xi32>
    %43 = tpu.iota {dimensions = array<i32: 1>} : vector<2x256x16xi32>
    %44 = vector.broadcast %42 : vector<2x1x16xi32> to vector<2x256x16xi32>
    %45 = arith.cmpi eq, %44, %43 : vector<2x256x16xi32>
    %46 = arith.extui %45 : vector<2x256x16xi1> to vector<2x256x16xi32>
    %47 = arith.sitofp %46 : vector<2x256x16xi32> to vector<2x256x16xf32>
    "tpu.trace_start"() <{level = 10 : i32, message = "bts,bvs->btv"}> : () -> ()
    %cst_21 = arith.constant dense<0.000000e+00> : vector<2x8x256xf32>
    %48 = tpu.matmul %41, %47, %cst_21 {dimension_numbers = #tpu.dot_dimension_numbers<[2], [2], [1], [1], [0, 0, 0, 1, 1, 1], [0], [0]>} : vector<2x8x16xf32>, vector<2x256x16xf32>, vector<2x8x256xf32> -> vector<2x8x256xf32>
    "tpu.trace_stop"() : () -> ()
    %49 = vector.extract_strided_slice %48 {offsets = [0, 0, 0], sizes = [2, 8, 128], strides = [1, 1, 1]} : vector<2x8x256xf32> to vector<2x8x128xf32>
    %50 = arith.addf %26, %49 : vector<2x8x128xf32>
    %cst_22 = arith.constant 1.000000e-18 : f32
    %51 = vector.broadcast %cst_22 : f32 to vector<2x8x128xf32>
    %52 = arith.addf %50, %51 : vector<2x8x128xf32>
    %53 = math.log %52 : vector<2x8x128xf32>
    %c0_23 = arith.constant 0 : index
    %c0_24 = arith.constant 0 : index
    %c0_25 = arith.constant 0 : index
    %54 = vector.load %arg6[%c0_23, %c0_24, %c0_25] : memref<2x8x256xf32, #tpu.memory_space<vmem>>, vector<2x8x128xf32>
    tpu.vector_store %arg6[%c0_23, %c0_24, %c0_25], %53 {strides = array<i32>} : memref<2x8x256xf32, #tpu.memory_space<vmem>>, vector<2x8x128xf32>,
    %55 = vector.extract_strided_slice %48 {offsets = [0, 0, 128], sizes = [2, 8, 128], strides = [1, 1, 1]} : vector<2x8x256xf32> to vector<2x8x128xf32>
    %cst_26 = arith.constant 1.000000e-18 : f32
    %56 = vector.broadcast %cst_26 : f32 to vector<2x8x128xf32>
    %57 = arith.addf %55, %56 : vector<2x8x128xf32>
    %58 = math.log %57 : vector<2x8x128xf32>
    %c0_27 = arith.constant 0 : index
    %c0_28 = arith.constant 0 : index
    %c128 = arith.constant 128 : index
    %59 = vector.load %arg6[%c0_27, %c0_28, %c128] : memref<2x8x256xf32, #tpu.memory_space<vmem>>, vector<2x8x128xf32>
    tpu.vector_store %arg6[%c0_27, %c0_28, %c128], %58 {strides = array<i32>} : memref<2x8x256xf32, #tpu.memory_space<vmem>>, vector<2x8x128xf32>,
    return
  }
  func.func @transform_0(%arg0: i32) -> (i32, i32, i32) {
    %c0_i32 = arith.constant 0 : i32
    %c0_i32_0 = arith.constant 0 : i32
    %c0_i32_1 = arith.constant 0 : i32
    return %arg0, %c0_i32, %c0_i32_0 : i32, i32, i32
  }
  func.func @transform_1(%arg0: i32) -> (i32, i32, i32) {
    %c0_i32 = arith.constant 0 : i32
    %c0_i32_0 = arith.constant 0 : i32
    %c0_i32_1 = arith.constant 0 : i32
    return %arg0, %c0_i32, %c0_i32_0 : i32, i32, i32
  }
  func.func @transform_2(%arg0: i32) -> (i32, i32, i32) {
    %c0_i32 = arith.constant 0 : i32
    %c0_i32_0 = arith.constant 0 : i32
    %c0_i32_1 = arith.constant 0 : i32
    return %arg0, %c0_i32, %c0_i32_0 : i32, i32, i32
  }
  func.func @transform_3(%arg0: i32) -> (i32, i32, i32) {
    %c0_i32 = arith.constant 0 : i32
    %c0_i32_0 = arith.constant 0 : i32
    %c0_i32_1 = arith.constant 0 : i32
    return %arg0, %c0_i32, %c0_i32_0 : i32, i32, i32
  }
  func.func @transform_4(%arg0: i32) -> (i32, i32) {
    %c0_i32 = arith.constant 0 : i32
    %c0_i32_0 = arith.constant 0 : i32
    %c0_i32_1 = arith.constant 0 : i32
    return %c0_i32, %c0_i32_0 : i32, i32
  }
  func.func @transform_5(%arg0: i32) -> (i32, i32, i32) {
    %c0_i32 = arith.constant 0 : i32
    %c0_i32_0 = arith.constant 0 : i32
    %c0_i32_1 = arith.constant 0 : i32
    return %arg0, %c0_i32, %c0_i32_0 : i32, i32, i32
  }
}

</mosaic_0001>

<bundles_post_ra>
// kernel: tpu_custom_call.1
= control target key start
LH: loop header
LB: loop body
LE: loop exit
PB: predicated region body
PF: predicated region fallthrough
CT: control target
= control target key end

     0   :  { %10 = vsyncpa [#allocation3], 0  ;;  %s1598_s0 = inlined_call_operand.hbm [shape: f32[2,8,32], index: 0, kind: input, shape index: {}]   ;;  %s1599_s1 = inlined_call_operand.hbm [shape: f32[2,1,256], index: 1, kind: input, shape index: {}]   ;;  %s1600_s2 = inlined_call_operand.hbm [shape: f32[2,8,16], index: 2, kind: input, shape index: {}]   ;;  %s1601_s3 = inlined_call_operand.vmem [shape: s32[2,1,16], index: 3, kind: input, shape index: {}]   ;;  %s1602_s4 = inlined_call_operand.hbm [shape: f32[32,256], index: 4, kind: input, shape index: {}]   ;;  %s1603_s5 = inlined_call_operand.hbm [shape: f32[2,8,256], index: 5, kind: output, shape index: {}]  }
   0x1   :  { %11 = vsyncpa [#allocation6], 0 }
   0x2   :  { %12 = vsyncpa [#allocation9], 0 }
   0x3   :  { %13 = vsyncpa [#allocation4], 0  ;;  %s1250_s18 = smov [#allocation5]  }
   0x4   :  { %s31_s19 = sshll.u32 %s1250_s18, 4  ;;  %s32_s19 = int_to_ptr.vmem [resolvable:$true] %s31_s19 }
   0x5   :  { %s1150_s20 = scalar_lea.vmem %s32_s19, 64  ;;  %p1155_p1 = scmp.lt.s32.totalorder %s32_s19, %s32_s19 }
   0x6   :  { %p1151_p0 = scmp.ne.s32.totalorder %s32_s19, %s1150_s20  ;;  %p1156_p2 = scmp.lt.s32.totalorder %s1150_s20, %s1150_s20 }
   0x8   :  { %p1157_p3 = por %p1156_p2, %p1155_p1 }
   0xa   :  { %p1158_p4 = pnand %p1157_p3, %p1151_p0 }
   0xc   :  { %1161 = shalt.err (!%p1158_p4)
}
   0xd   :  { %s1251_s21 = smov 32   ;;  %s1252_s22 = smov 2  }
   0xe   :  { %37 = dma.hbm_to_vmem [thread:$0]  %s1599_s1, 64, %s32_s19, [#allocation6], %s1251_s21, %s1251_s21, %s1252_s22  }
   0xf   :  { %s1253_s25 = smov [#allocation2]  }
  0x10   :  { %s19_s26 = sshll.u32 %s1253_s25, 4  ;;  %s20_s26 = int_to_ptr.vmem [resolvable:$true] %s19_s26 }
  0x11   :  { %s1170_s27 = scalar_lea.vmem %s20_s26, 256  ;;  %p1175_p6 = scmp.lt.s32.totalorder %s20_s26, %s20_s26 }
  0x12   :  { %p1171_p5 = scmp.ne.s32.totalorder %s20_s26, %s1170_s27  ;;  %p1176_p7 = scmp.lt.s32.totalorder %s1170_s27, %s1170_s27 }
  0x14   :  { %p1177_p8 = por %p1176_p7, %p1175_p6 }
  0x16   :  { %p1178_p9 = pnand %p1177_p8, %p1171_p5 }
  0x18   :  { %1181 = shalt.err (!%p1178_p9)
}
  0x19   :  { %s1254_s28 = smov 128   ;;  %s1255_s29 = smov 8  }
  0x1a   :  { %25 = dma.hbm_to_vmem [thread:$0]  %s1598_s0, 256, %s20_s26, [#allocation3], %s1254_s28, %s1254_s28, %s1255_s29  }
  0x1b   :  { %s1256_s7 = smov [#allocation7]   ;;  %s1257_s9 = smov [#allocation8]  }
  0x1c   :  { %s43_s8 = sshll.u32 %s1256_s7, 4  ;;  %s57_s1 = sshll.u32 %s1257_s9, 4  ;;  %s44_s8 = int_to_ptr.vmem [resolvable:$true] %s43_s8  ;;  %s58_s1 = int_to_ptr.vmem [resolvable:$true] %s57_s1 }
  0x1d   :  { %s1190_s10 = scalar_lea.vmem %s44_s8, 256  ;;  %p1195_p11 = scmp.lt.s32.totalorder %s44_s8, %s44_s8 }
  0x1e   :  { %p1191_p10 = scmp.ne.s32.totalorder %s44_s8, %s1190_s10  ;;  %p1196_p12 = scmp.lt.s32.totalorder %s1190_s10, %s1190_s10 }
  0x20   :  { %p1197_p13 = por %p1196_p12, %p1195_p11 }
  0x22   :  { %p1198_p0 = pnand %p1197_p13, %p1191_p10 }
  0x24   :  { %1201 = shalt.err (!%p1198_p0)
}
  0x25   :  { %49 = dma.hbm_to_vmem [thread:$0]  %s1600_s2, 256, %s44_s8, [#allocation6], %s1254_s28, %s1254_s28, %s1255_s29  }
  0x26   :  { %s1210_s13 = scalar_lea.vmem %s58_s1, 1024  ;;  %p1215_p2 = scmp.lt.s32.totalorder %s58_s1, %s58_s1 }
  0x27   :  { %p1211_p1 = scmp.ne.s32.totalorder %s58_s1, %s1210_s13  ;;  %p1216_p3 = scmp.lt.s32.totalorder %s1210_s13, %s1210_s13 }
  0x29   :  { %p1217_p4 = por %p1216_p3, %p1215_p2 }
  0x2b   :  { %p1218_p5 = pnand %p1217_p4, %p1211_p1 }
  0x2d   :  { %1221 = shalt.err (!%p1218_p5)
}
  0x2e   :  { %s1258_s0 = smov 256   ;;  %s1259_s14 = smov 16  }
  0x2f   :  { %63 = dma.hbm_to_vmem [thread:$0]  %s1602_s4, 1024, %s58_s1, [#allocation9], %s1258_s0, %s1258_s0, %s1259_s14  }
  0x30   :  { %1242 = dma.done.wait [#allocation3], 256  }
  0x31   :  { %1243 = vsyncadd [#allocation3], 4294967040 }
  0x32   :  { %1244 = dma.done.wait [#allocation6], 320  }
  0x33   :  { %1245 = vsyncadd [#allocation6], 4294966976 }
  0x34   :  { %1246 = dma.done.wait [#allocation9], 1024  }
  0x35   :  { %1247 = vsyncadd [#allocation9], 4294966272  ;;  %v1260_v0 = vmov 0.0   ;;  %vm242_vm0 = vcmask 130048   ;;  %v240_v1 = vld [vmem:[#allocation7] sm:$0xff]  ;;  %v241_v2 = vld [vmem:[#allocation7 + $0x8] sm:$0xff]  ;;  %v174_v26 = vlaneseq }
  0x36   :  { %157 = vmatprep.mubr.f32.mxu0 %v1260_v0  ;;  %v85_v3 = vld [vmem:[#allocation8 + $0x38] sm:$0xff]  ;;  %v243_v4 = vsel %vm242_vm0, %v240_v1, -inf  ;;  %v84_v5 = vld [vmem:[#allocation8 + $0x30] sm:$0xff]  ;;  %v83_v6 = vld [vmem:[#allocation8 + $0x28] sm:$0xff]  ;;  %v246_v9 = vsel %vm242_vm0, %v241_v2, -inf  ;;  %vm86_vm1 = vcmask 261120  }
  0x37   :  { %117 = vmatprep.subr.mxu0 %v85_v3  ;;  %v82_v7 = vld [vmem:[#allocation8 + $0x20] sm:$0xff]  ;;  %244 = vmax.xlane.f32.xlu0 %v243_v4  ;;  %v81_v8 = vld [vmem:[#allocation8 + $0x18] sm:$0xff]  ;;  %v80_v10 = vld [vmem:[#allocation8 + $0x10] sm:$0xff]  ;;  %v1261_v25 = vmov 0   ;;  %v1320_v27 = vshrl.u32 %v174_v26, 7 }
  0x38   :  { %118 = vmatpush1.msra.mxu0 %v84_v5  ;;  %v79_v11 = vld [vmem:[#allocation8 + $0x8] sm:$0xff]  ;;  %v78_v12 = vld [vmem:[#allocation8] sm:$0xff]  ;;  %1108 = vset.pattern.permute.xlu0 %v1261_v25  ;;  %v1333_v33 = vld [vmem:[%s1601_s3] ss:$0 sm:$0xff] }
  0x39   :  { %119 = vmatprep.subr.mxu0 %v83_v6  ;;  %v76_v13 = vld [vmem:[#allocation2] sm:$0xff]  ;;  %v77_v14 = vld [vmem:[#allocation2 + $0x8] sm:$0xff]  ;;  %1109 = vset.pattern.permute.xlu1 %v1261_v25  ;;  %v176_v28 = vsub.s32 0, %v1320_v27  ;;  %v1323_v29 = vld [vmem:[#allocation5] sm:$0x3]  ;;  %v313_v34 = vadd.s32 248, %v1320_v27 }
  0x3a   :  { %120 = vmatpush1.msra.mxu0 %v82_v7  ;;  %v297_v35 = vadd.s32 120, %v1320_v27  ;;  %v312_v36 = vadd.s32 240, %v1320_v27  ;;  %v296_v37 = vadd.s32 112, %v1320_v27  ;;  %v1342_v38 = vld [vmem:[%s1601_s3 + $0x1] ss:$0 sm:$0xff]  ;;  %v311_v39 = vadd.s32 232, %v1320_v27 }
  0x3b   :  { %121 = vmatprep.subr.mxu0 %v81_v8  ;;  %247 = vmax.xlane.f32.xlu0 %v246_v9  ;;  %v177_v30 = vrot.slane %v1323_v29, %v176_v28  ;;  %v295_v40 = vadd.s32 104, %v1320_v27  ;;  %vm353_vm2 = vcmp.eq.s32.totalorder %v1333_v33, %v313_v34  ;;  %vm385_vm5 = vcmp.eq.s32.totalorder %v1342_v38, %v313_v34  ;;  %s1262_s3 = smov [#allocation10]  }
  0x3c   :  { %122 = vmatpush1.msra.mxu0 %v80_v10  ;;  %vm337_vm3 = vcmp.eq.s32.totalorder %v1333_v33, %v297_v35  ;;  %vm352_vm4 = vcmp.eq.s32.totalorder %v1333_v33, %v312_v36  ;;  %v928_v41 = vsel %vm353_vm2, 1.0, %v1260_v0  ;;  %v310_v44 = vadd.s32 224, %v1320_v27  ;;  %s877_s19 = sshll.u32 %s1262_s3, 4  ;;  %s878_s19 = int_to_ptr.vmem [resolvable:$true] %s877_s19 }
  0x3d   :  { %123 = vmatprep.subr.mxu0 %v79_v11  ;;  %v912_v42 = vsel %vm337_vm3, 1.0, %v1260_v0  ;;  %v927_v43 = vsel %vm352_vm4, 1.0, %v1260_v0  ;;  %1027 = vmatprep.subr.msk.mxu1 %vm242_vm0, %v928_v41  ;;  %v960_v45 = vsel %vm385_vm5, 1.0, %v1260_v0  ;;  %vm336_vm6 = vcmp.eq.s32.totalorder %v1333_v33, %v296_v37  ;;  %s1222_s20 = scalar_lea.vmem %s878_s19, 512  ;;  %p1227_p7 = scmp.lt.s32.totalorder %s878_s19, %s878_s19 }
  0x3e   :  { %124 = vmatpush1.msra.mxu0 %v78_v12  ;;  %vm369_vm7 = vcmp.eq.s32.totalorder %v1342_v38, %v297_v35  ;;  %vm351_vm8 = vcmp.eq.s32.totalorder %v1333_v33, %v311_v39  ;;  %1028 = vmatpush3.xpose.msk.msra.mxu1 %vm242_vm0, %v912_v42  ;;  %vm384_vm9 = vcmp.eq.s32.totalorder %v1342_v38, %v312_v36  ;;  %v911_v47 = vsel %vm336_vm6, 1.0, %v1260_v0  ;;  %p1223_p6 = scmp.ne.s32.totalorder %s878_s19, %s1222_s20  ;;  %p1228_p8 = scmp.lt.s32.totalorder %s1222_s20, %s1222_s20 }
  0x3f   :  { %891 = vmatmul.mubr.msk.f32.vlgmr.msra.gmra.mxu0 %vm86_vm1, %v76_v13  ;;  %1061 = vmatprep.subr.msk.mxu0 %vm242_vm0, %v960_v45  ;;  %v944_v46 = vsel %vm369_vm7, 1.0, %v1260_v0  ;;  %v926_v48 = vsel %vm351_vm8, 1.0, %v1260_v0  ;;  %v959_v49 = vsel %vm384_vm9, 1.0, %v1260_v0  ;;  %vm368_vm10 = vcmp.eq.s32.totalorder %v1342_v38, %v296_v37 }
  0x40   :  { %163 = vmatprep.mubr.f32.mxu0 %v1260_v0  ;;  %1029 = vmatprep.subr.msk.mxu1 %vm242_vm0, %v927_v43  ;;  %vm335_vm11 = vcmp.eq.s32.totalorder %v1333_v33, %v295_v40  ;;  %v943_v50 = vsel %vm368_vm10, 1.0, %v1260_v0  ;;  %vm350_vm12 = vcmp.eq.s32.totalorder %v1333_v33, %v310_v44  ;;  %vm383_vm13 = vcmp.eq.s32.totalorder %v1342_v38, %v311_v39  ;;  %p1229_p9 = por %p1228_p8, %p1227_p7 }
  0x41   :  { %1062 = vmatpush3.xpose.msk.msra.mxu0 %vm242_vm0, %v944_v46  ;;  %v958_v51 = vsel %vm383_vm13, 1.0, %v1260_v0  ;;  %v294_v52 = vadd.s32 96, %v1320_v27  ;;  %vm367_vm14 = vcmp.eq.s32.totalorder %v1342_v38, %v295_v40  ;;  %v309_v53 = vadd.s32 216, %v1320_v27  ;;  %v1471_v40 = vld [vmem:[#allocation5 + $0x2] sm:$0x3] }
  0x42   :  { %1063 = vmatprep.subr.msk.mxu0 %vm242_vm0, %v959_v49  ;;  %1030 = vmatpush3.xpose.msk.msra.mxu1 %vm242_vm0, %v911_v47  ;;  %vm382_vm15 = vcmp.eq.s32.totalorder %v1342_v38, %v310_v44  ;;  %v910_v54 = vsel %vm335_vm11, 1.0, %v1260_v0  ;;  %v925_v55 = vsel %vm350_vm12, 1.0, %v1260_v0  ;;  %v942_v56 = vsel %vm367_vm14, 1.0, %v1260_v0  ;;  %p1230_p10 = pnand %p1229_p9, %p1223_p6 }
  0x43   :  { %892 = vmatmul.mubr.msk.f32.gmra.mxu0 %vm86_vm1, %v77_v14  ;;  %1031 = vmatprep.subr.msk.mxu1 %vm242_vm0, %v926_v48  ;;  %vm334_vm1 = vcmp.eq.s32.totalorder %v1333_v33, %v294_v52  ;;  %v293_v57 = vadd.s32 88, %v1320_v27  ;;  %vm349_vm2 = vcmp.eq.s32.totalorder %v1333_v33, %v309_v53  ;;  %v957_v58 = vsel %vm382_vm15, 1.0, %v1260_v0 }
  0x44   :  { %vm366_vm3 = vcmp.eq.s32.totalorder %v1342_v38, %v294_v52  ;;  %v308_v59 = vadd.s32 208, %v1320_v27  ;;  %vm381_vm4 = vcmp.eq.s32.totalorder %v1342_v38, %v309_v53  ;;  %v909_v60 = vsel %vm334_vm1, 1.0, %v1260_v0 }
  0x45   :  { %1064 = vmatpush3.xpose.msk.msra.mxu0 %vm242_vm0, %v943_v50  ;;  %v924_v61 = vsel %vm349_vm2, 1.0, %v1260_v0  ;;  %vm333_vm5 = vcmp.eq.s32.totalorder %v1333_v33, %v293_v57  ;;  %v941_v62 = vsel %vm366_vm3, 1.0, %v1260_v0  ;;  %v292_v63 = vadd.s32 80, %v1320_v27 }
  0x46   :  { %1065 = vmatprep.subr.msk.mxu0 %vm242_vm0, %v958_v51  ;;  %1032 = vmatpush3.xpose.msk.msra.mxu1 %vm242_vm0, %v910_v54  ;;  %vm348_vm6 = vcmp.eq.s32.totalorder %v1333_v33, %v308_v59  ;;  %vm365_vm7 = vcmp.eq.s32.totalorder %v1342_v38, %v293_v57  ;;  %vm380_vm8 = vcmp.eq.s32.totalorder %v1342_v38, %v308_v59  ;;  %v908_v3 = vsel %vm333_vm5, 1.0, %v1260_v0 }
  0x47   :  { %1033 = vmatprep.subr.msk.mxu1 %vm242_vm0, %v925_v55  ;;  %v923_v4 = vsel %vm348_vm6, 1.0, %v1260_v0  ;;  %vm332_vm9 = vcmp.eq.s32.totalorder %v1333_v33, %v292_v63  ;;  %v940_v5 = vsel %vm365_vm7, 1.0, %v1260_v0  ;;  %v291_v6 = vadd.s32 72, %v1320_v27 }
  0x48   :  { %v955_v7 = vsel %vm380_vm8, 1.0, %v1260_v0  ;;  %vm364_vm11 = vcmp.eq.s32.totalorder %v1342_v38, %v292_v63  ;;  %v306_v8 = vadd.s32 192, %v1320_v27  ;;  %v907_v9 = vsel %vm332_vm9, 1.0, %v1260_v0 }
  0x49   :  { %1066 = vmatpush3.xpose.msk.msra.mxu0 %vm242_vm0, %v942_v56  ;;  %vm331_vm13 = vcmp.eq.s32.totalorder %v1333_v33, %v291_v6  ;;  %v939_v11 = vsel %vm364_vm11, 1.0, %v1260_v0  ;;  %v290_v12 = vadd.s32 64, %v1320_v27  ;;  %vm363_vm15 = vcmp.eq.s32.totalorder %v1342_v38, %v291_v6 }
  0x4a   :  { %1067 = vmatprep.subr.msk.mxu0 %vm242_vm0, %v957_v58  ;;  %1034 = vmatpush3.xpose.msk.msra.mxu1 %vm242_vm0, %v909_v60  ;;  %vm346_vm14 = vcmp.eq.s32.totalorder %v1333_v33, %v306_v8  ;;  %v305_v14 = vadd.s32 184, %v1320_v27  ;;  %vm378_vm1 = vcmp.eq.s32.totalorder %v1342_v38, %v306_v8  ;;  %v303_v35 = vadd.s32 168, %v1320_v27 }
  0x4b   :  { %1035 = vmatprep.subr.msk.mxu1 %vm242_vm0, %v924_v61  ;;  %vm330_vm2 = vcmp.eq.s32.totalorder %v1333_v33, %v290_v12  ;;  %v302_v44 = vadd.s32 160, %v1320_v27  ;;  %v286_v51 = vadd.s32 32, %v1320_v27  ;;  %v301_v53 = vadd.s32 152, %v1320_v27 }
  0x4c   :  { %vm345_vm3 = vcmp.eq.s32.totalorder %v1333_v33, %v305_v14  ;;  %vm377_vm5 = vcmp.eq.s32.totalorder %v1342_v38, %v305_v14  ;;  %vm343_vm11 = vcmp.eq.s32.totalorder %v1333_v33, %v303_v35  ;;  %v285_v59 = vadd.s32 24, %v1320_v27 }
  0x4d   :  { %1068 = vmatpush3.xpose.msk.msra.mxu0 %vm242_vm0, %v941_v62  ;;  %v920_v26 = vsel %vm345_vm3, 1.0, %v1260_v0  ;;  %v952_v34 = vsel %vm377_vm5, 1.0, %v1260_v0  ;;  %v918_v49 = vsel %vm343_vm11, 1.0, %v1260_v0  ;;  %vm326_vm3 = vcmp.eq.s32.totalorder %v1333_v33, %v286_v51 }
  0x4e   :  { %1036 = vmatpush3.xpose.msk.msra.mxu1 %vm242_vm0, %v908_v3  ;;  %vm358_vm5 = vcmp.eq.s32.totalorder %v1342_v38, %v286_v51  ;;  %v300_v61 = vadd.s32 144, %v1320_v27  ;;  %v901_v63 = vsel %vm326_vm3, 1.0, %v1260_v0  ;;  %v284_v3 = vadd.s32 16, %v1320_v27 }
  0x4f   :  { %1037 = vmatprep.subr.msk.mxu1 %vm242_vm0, %v923_v4 }
  0x50   :  { %vm324_vm11 = vcmp.eq.s32.totalorder %v1333_v33, %v284_v3 }
  0x52   :  { %1038 = vmatpush3.xpose.msk.msra.mxu1 %vm242_vm0, %v907_v9  ;;  %v283_v9 = vadd.s32 8, %v1320_v27 }
  0x54   :  { %vm355_vm3 = vcmp.eq.s32.totalorder %v1342_v38, %v283_v9 }
  0xc0   :  { %v245_v15 = vpop.xlane.xlu0 %244 }
  0xc1   :  { %v249_v16 = vsub.f32 %v240_v1, %v245_v15  ;;  %v956_v1 = vsel %vm381_vm4, 1.0, %v1260_v0  ;;  %v906_v15 = vsel %vm331_vm13, 1.0, %v1260_v0  ;;  %vm362_vm4 = vcmp.eq.s32.totalorder %v1342_v38, %v290_v12 }
  0xc2   :  { %1069 = vmatprep.subr.msk.mxu0 %vm242_vm0, %v956_v1  ;;  %vm375_vm13 = vcmp.eq.s32.totalorder %v1342_v38, %v303_v35  ;;  %v899_v12 = vsel %vm324_vm11, 1.0, %v1260_v0 }
  0xc3   :  { %v251_v17 = vmul.f32 1.442695, %v249_v16  ;;  %1070 = vmatpush3.xpose.msk.msra.mxu0 %vm242_vm0, %v940_v5  ;;  %v921_v16 = vsel %vm346_vm14, 1.0, %v1260_v0  ;;  %v950_v52 = vsel %vm375_vm13, 1.0, %v1260_v0  ;;  %v299_v5 = vadd.s32 136, %v1320_v27 }
  0xc4   :  { %v248_v18 = vpop.xlane.xlu0 %247  ;;  %1071 = vmatprep.subr.msk.mxu0 %vm242_vm0, %v955_v7  ;;  %vm356_vm13 = vcmp.eq.s32.totalorder %v1342_v38, %v284_v3 }
  0xc5   :  { %1110 = vpow2.f32 %v251_v17  ;;  %v250_v19 = vsub.f32 %v241_v2, %v248_v18  ;;  %v307_v2 = vadd.s32 200, %v1320_v27  ;;  %v938_v17 = vsel %vm363_vm15, 1.0, %v1260_v0 }
  0xc6   :  { %v289_v18 = vadd.s32 56, %v1320_v27  ;;  %vm342_vm15 = vcmp.eq.s32.totalorder %v1333_v33, %v302_v44  ;;  %v931_v14 = vsel %vm356_vm13, 1.0, %v1260_v0 }
  0xc7   :  { %v253_v20 = vmul.f32 1.442695, %v250_v19  ;;  %vm347_vm10 = vcmp.eq.s32.totalorder %v1333_v33, %v307_v2  ;;  %vm379_vm12 = vcmp.eq.s32.totalorder %v1342_v38, %v307_v2  ;;  %1072 = vmatpush3.xpose.msk.msra.mxu0 %vm242_vm0, %v939_v11  ;;  %v953_v19 = vsel %vm378_vm1, 1.0, %v1260_v0 }
  0xc8   :  { %v922_v10 = vsel %vm347_vm10, 1.0, %v1260_v0  ;;  %v954_v13 = vsel %vm379_vm12, 1.0, %v1260_v0  ;;  %vm329_vm6 = vcmp.eq.s32.totalorder %v1333_v33, %v289_v18  ;;  %vm361_vm8 = vcmp.eq.s32.totalorder %v1342_v38, %v289_v18 }
  0xc9   :  { %1112 = vpow2.f32 %v253_v20  ;;  %1039 = vmatprep.subr.msk.mxu1 %vm242_vm0, %v922_v10  ;;  %1073 = vmatprep.subr.msk.mxu0 %vm242_vm0, %v954_v13  ;;  %v304_v20 = vadd.s32 176, %v1320_v27  ;;  %v904_v37 = vsel %vm329_vm6, 1.0, %v1260_v0  ;;  %v936_v42 = vsel %vm361_vm8, 1.0, %v1260_v0 }
  0xca   :  { %1040 = vmatpush3.xpose.msk.msra.mxu1 %vm242_vm0, %v906_v15  ;;  %v917_v57 = vsel %vm342_vm15, 1.0, %v1260_v0  ;;  %vm373_vm6 = vcmp.eq.s32.totalorder %v1342_v38, %v301_v53  ;;  %v933_v2 = vsel %vm358_vm5, 1.0, %v1260_v0  ;;  %vm340_vm8 = vcmp.eq.s32.totalorder %v1333_v33, %v300_v61 }
  0xcb   :  { %1041 = vmatprep.subr.msk.mxu1 %vm242_vm0, %v921_v16  ;;  %1074 = vmatpush3.xpose.msk.msra.mxu0 %vm242_vm0, %v938_v17  ;;  %vm344_vm7 = vcmp.eq.s32.totalorder %v1333_v33, %v304_v20  ;;  %vm376_vm9 = vcmp.eq.s32.totalorder %v1342_v38, %v304_v20  ;;  %v948_v4 = vsel %vm373_vm6, 1.0, %v1260_v0  ;;  %v915_v7 = vsel %vm340_vm8, 1.0, %v1260_v0 }
  0xcc   :  { %1075 = vmatprep.subr.msk.mxu0 %vm242_vm0, %v953_v19  ;;  %v919_v41 = vsel %vm344_vm7, 1.0, %v1260_v0  ;;  %v951_v43 = vsel %vm376_vm9, 1.0, %v1260_v0  ;;  %vm325_vm7 = vcmp.eq.s32.totalorder %v1333_v33, %v285_v59  ;;  %vm357_vm9 = vcmp.eq.s32.totalorder %v1342_v38, %v285_v59 }
  0xcd   :  { %v900_v6 = vsel %vm325_vm7, 1.0, %v1260_v0  ;;  %v932_v8 = vsel %vm357_vm9, 1.0, %v1260_v0  ;;  %v298_v11 = vadd.s32 128, %v1320_v27  ;;  %vm323_vm15 = vcmp.eq.s32.totalorder %v1333_v33, %v283_v9 }
  0xce   :  { %v898_v16 = vsel %vm323_vm15, 1.0, %v1260_v0  ;;  %vm354_vm5 = vcmp.eq.s32.totalorder %v1342_v38, %v1320_v27 }
  0xd2   :  { %v1312_v21 = vpop.eup %1110 }
  0xd3   :  { %v255_v22 = vsel %vm242_vm0, %v1312_v21, 0.0 }
  0xd4   :  { %256 = vadd.xlane.f32.xlu1 %v255_v22  ;;  %v180_v22 = vsub.s32 1, %v1320_v27 }
  0xd6   :  { %v1316_v23 = vpop.eup %1112  ;;  %v181_v36 = vrot.slane %v1323_v29, %v180_v22  ;;  %v287_v29 = vadd.s32 40, %v1320_v27  ;;  %v189_v46 = vrot.slane %v1471_v40, %v180_v22 }
  0xd7   :  { %v258_v24 = vsel %vm242_vm0, %v1316_v23, 0.0 }
  0xd8   :  { %259 = vadd.xlane.f32.xlu1 %v258_v24  ;;  %v905_v24 = vsel %vm330_vm2, 1.0, %v1260_v0  ;;  %vm327_vm14 = vcmp.eq.s32.totalorder %v1333_v33, %v287_v29  ;;  %vm359_vm1 = vcmp.eq.s32.totalorder %v1342_v38, %v287_v29  ;;  %vm374_vm2 = vcmp.eq.s32.totalorder %v1342_v38, %v302_v44 }
  0xd9   :  { %1042 = vmatpush3.xpose.msk.msra.mxu1 %vm242_vm0, %v905_v24  ;;  %v902_v56 = vsel %vm327_vm14, 1.0, %v1260_v0  ;;  %v934_v58 = vsel %vm359_vm1, 1.0, %v1260_v0  ;;  %v949_v60 = vsel %vm374_vm2, 1.0, %v1260_v0  ;;  %vm371_vm14 = vcmp.eq.s32.totalorder %v1342_v38, %v299_v5 }
  0xda   :  { %1043 = vmatprep.subr.msk.mxu1 %vm242_vm0, %v920_v26  ;;  %vm338_vm1 = vcmp.eq.s32.totalorder %v1333_v33, %v298_v11  ;;  %v946_v15 = vsel %vm371_vm14, 1.0, %v1260_v0  ;;  %vm322_vm2 = vcmp.eq.s32.totalorder %v1333_v33, %v1320_v27  ;;  %v185_v44 = vrot.slane %v1471_v40, %v176_v28 }
  0xdb   :  { %v913_v18 = vsel %vm338_vm1, 1.0, %v1260_v0 }
  0xdd   :  { %1044 = vmatpush3.xpose.msk.msra.mxu1 %vm242_vm0, %v904_v37 }
  0xde   :  { %1045 = vmatprep.subr.msk.mxu1 %vm242_vm0, %v919_v41  ;;  %v929_v41 = vsel %vm354_vm5, 1.0, %v1260_v0 }
  0xff   :  { %v159_v31 = vpop.f32.mrf.mxu0 }
 0x100   :  { %v1328_v32 = vadd.f32 %v177_v30, %v159_v31  ;;  %v937_v30 = vsel %vm362_vm4, 1.0, %v1260_v0  ;;  %v288_v31 = vadd.s32 48, %v1320_v27  ;;  %vm341_vm4 = vcmp.eq.s32.totalorder %v1333_v33, %v301_v53 }
 0x101   :  { %v161_v25 = vpop.f32.mrf.mxu0  ;;  %1076 = vmatpush3.xpose.msk.msra.mxu0 %vm242_vm0, %v937_v30  ;;  %v916_v1 = vsel %vm341_vm4, 1.0, %v1260_v0  ;;  %v897_v30 = vsel %vm322_vm2, 1.0, %v1260_v0  ;;  %vm370_vm4 = vcmp.eq.s32.totalorder %v1342_v38, %v298_v11 }
 0x102   :  { %1077 = vmatprep.subr.msk.mxu0 %vm242_vm0, %v952_v34  ;;  %vm328_vm10 = vcmp.eq.s32.totalorder %v1333_v33, %v288_v31  ;;  %vm360_vm12 = vcmp.eq.s32.totalorder %v1342_v38, %v288_v31  ;;  %v195_v45 = vadd.f32 %v181_v36, %v161_v25  ;;  %v930_v31 = vsel %vm355_vm3, 1.0, %v1260_v0 }
 0x103   :  { %v1469_v39 = vpop.f32.mrf.mxu0  ;;  %v903_v47 = vsel %vm328_vm10, 1.0, %v1260_v0  ;;  %v935_v50 = vsel %vm360_vm12, 1.0, %v1260_v0  ;;  %vm372_vm10 = vcmp.eq.s32.totalorder %v1342_v38, %v300_v61  ;;  %vm339_vm12 = vcmp.eq.s32.totalorder %v1333_v33, %v299_v5 }
 0x104   :  { %1046 = vmatpush3.xpose.msk.msra.mxu1 %vm242_vm0, %v903_v47  ;;  %v893_v54 = vmul.f32 -1.442695, %v195_v45  ;;  %v947_v10 = vsel %vm372_vm10, 1.0, %v1260_v0  ;;  %v914_v13 = vsel %vm339_vm12, 1.0, %v1260_v0  ;;  %v945_v33 = vsel %vm370_vm4, 1.0, %v1260_v0 }
 0x105   :  { %1078 = vmatpush3.xpose.msk.msra.mxu0 %vm242_vm0, %v936_v42  ;;  %v167_v48 = vpop.f32.mrf.mxu0  ;;  %1047 = vmatprep.subr.msk.mxu1 %vm242_vm0, %v918_v49  ;;  %v196_v45 = vadd.f32 %v185_v44, %v1469_v39 }
 0x106   :  { %1079 = vmatprep.subr.msk.mxu0 %vm242_vm0, %v951_v43  ;;  %v197_v55 = vadd.f32 %v189_v46, %v167_v48  ;;  %1114 = vpow2.f32 %v893_v54 }
 0x108   :  { %1048 = vmatpush3.xpose.msk.msra.mxu1 %vm242_vm0, %v902_v56  ;;  %v894_v62 = vmul.f32 -1.442695, %v197_v55 }
 0x109   :  { %1080 = vmatpush3.xpose.msk.msra.mxu0 %vm242_vm0, %v935_v50  ;;  %1049 = vmatprep.subr.msk.mxu1 %vm242_vm0, %v917_v57 }
 0x10a   :  { %1081 = vmatprep.subr.msk.mxu0 %vm242_vm0, %v950_v52  ;;  %1116 = vpow2.f32 %v894_v62 }
 0x10c   :  { %1050 = vmatpush3.xpose.msk.msra.mxu1 %vm242_vm0, %v901_v63 }
 0x10d   :  { %1082 = vmatpush3.xpose.msk.msra.mxu0 %vm242_vm0, %v934_v58  ;;  %1051 = vmatprep.subr.msk.mxu1 %vm242_vm0, %v916_v1 }
 0x10e   :  { %1083 = vmatprep.subr.msk.mxu0 %vm242_vm0, %v949_v60 }
 0x110   :  { %1052 = vmatpush3.xpose.msk.msra.mxu1 %vm242_vm0, %v900_v6 }
 0x111   :  { %1084 = vmatpush3.xpose.msk.msra.mxu0 %vm242_vm0, %v933_v2  ;;  %1053 = vmatprep.subr.msk.mxu1 %vm242_vm0, %v915_v7 }
 0x112   :  { %1085 = vmatprep.subr.msk.mxu0 %vm242_vm0, %v948_v4 }
 0x113   :  { %v1115_v17 = vpop.eup %1114 }
 0x114   :  { %1054 = vmatpush3.xpose.msk.msra.mxu1 %vm242_vm0, %v899_v12  ;;  %v204_v20 = vadd.f32 1.0, %v1115_v17 }
 0x115   :  { %1086 = vmatpush3.xpose.msk.msra.mxu0 %vm242_vm0, %v932_v8  ;;  %1055 = vmatprep.subr.msk.mxu1 %vm242_vm0, %v914_v13 }
 0x116   :  { %1087 = vmatprep.subr.msk.mxu0 %vm242_vm0, %v947_v10  ;;  %1118 = vrcp.f32 %v204_v20 }
 0x117   :  { %v1117_v19 = vpop.eup %1116 }
 0x118   :  { %1056 = vmatpush3.xpose.msk.msra.mxu1 %vm242_vm0, %v898_v16  ;;  %v205_v22 = vadd.f32 1.0, %v1117_v19 }
 0x119   :  { %1088 = vmatpush3.xpose.msk.msra.mxu0 %vm242_vm0, %v931_v14  ;;  %1057 = vmatprep.subr.msk.mxu1 %vm242_vm0, %v913_v18 }
 0x11a   :  { %1089 = vmatprep.subr.msk.mxu0 %vm242_vm0, %v946_v15  ;;  %1120 = vrcp.f32 %v205_v22 }
 0x11c   :  { %1058 = vmatpush3.xpose.msk.msra.mxu1 %vm242_vm0, %v897_v30 }
 0x11d   :  { %1090 = vmatpush3.xpose.msk.msra.mxu0 %vm242_vm0, %v930_v31 }
 0x11e   :  { %1091 = vmatprep.subr.msk.mxu0 %vm242_vm0, %v945_v33 }
 0x121   :  { %1092 = vmatpush3.xpose.msk.msra.mxu0 %vm242_vm0, %v929_v41 }
 0x123   :  { %v1558_v26 = vpop.eup %1118 }
 0x124   :  { %v261_v35 = vsub.f32 1.0, %v1558_v26 }
 0x127   :  { %v1565_v34 = vpop.eup %1120 }
 0x128   :  { %v262_v42 = vsub.f32 1.0, %v1565_v34 }
 0x15d   :  { %v257_v24 = vpop.xlane.xlu1 %256 }
 0x15e   :  { %1122 = vrcp.f32 %v257_v24 }
 0x161   :  { %v260_v25 = vpop.xlane.xlu1 %259 }
 0x162   :  { %1124 = vrcp.f32 %v260_v25 }
 0x16b   :  { %v1123_v36 = vpop.eup %1122 }
 0x16c   :  { %v264_v37 = vmul.f32 %v1123_v36, %v261_v35 }
 0x16e   :  { %269 = vperm.xlu0 %1108, %v264_v37  }
 0x16f   :  { %v1125_v29 = vpop.eup %1124 }
 0x170   :  { %v266_v43 = vmul.f32 %v1125_v29, %v262_v42 }
 0x172   :  { %274 = vperm.xlu1 %1109, %v266_v43  }
 0x18d   :  { %212 = vmax.xlane.f32.xlu0 %v196_v45 }
 0x196   :  { %210 = vmax.xlane.f32.xlu1 %v1328_v32 }
 0x1e9   :  { %v270_v38 = vpop.permute.xlu0 %269 }
 0x1ea   :  { %v277_v0 = vmul.f32 %v1312_v21, %v270_v38 }
 0x1ec   :  { %1059 = vmatprep.mubr.msk.f32.mxu1 %vm242_vm0, %v277_v0 }
 0x1ed   :  { %1060 = vmatmul.mubr.msk.f32.vlgmr.msra.gmra.mxu1 %vm242_vm0, %v277_v0  ;;  %v275_v46 = vpop.permute.xlu1 %274 }
 0x1ee   :  { %v278_v47 = vmul.f32 %v1316_v23, %v275_v46 }
 0x1f0   :  { %1093 = vmatprep.mubr.msk.f32.mxu0 %vm242_vm0, %v278_v47 }
 0x1f1   :  { %1094 = vmatmul.mubr.msk.f32.vlgmr.msra.gmra.mxu0 %vm242_vm0, %v278_v47 }
 0x216   :  { %v213_v27 = vpop.xlane.xlu0 %212 }
 0x217   :  { %v215_v39 = vsub.f32 %v196_v45, %v213_v27 }
 0x219   :  { %v218_v49 = vmul.f32 1.442695, %v215_v39 }
 0x21f   :  { %v211_v28 = vpop.xlane.xlu1 %210 }
 0x220   :  { %v214_v40 = vsub.f32 %v1328_v32, %v211_v28 }
 0x222   :  { %v216_v48 = vmul.f32 1.442695, %v214_v40 }
 0x224   :  { %1126 = vpow2.f32 %v216_v48 }
 0x225   :  { %1128 = vpow2.f32 %v218_v49 }
 0x231   :  { %v1127_v21 = vpop.eup %1126 }
 0x232   :  { %220 = vadd.xlane.f32.xlu1 %v1127_v21  ;;  %v1129_v50 = vpop.eup %1128 }
 0x236   :  { %222 = vadd.xlane.f32.xlu1 %v1129_v50 }
 0x2ad   :  { %v679_v51 = vpop.f32.mrf.mxu1 }
 0x2af   :  { %v681_v52 = vpop.f32.mrf.mxu1 }
 0x2b0   :  { %v864_v23 = vadd.f32 1e-18, %v681_v52 }
 0x2b1   :  { %v849_v53 = vpop.f32.mrf.mxu0 }
 0x2b2   :  { %1130 = vlog2.f32 %v864_v23 }
 0x2b3   :  { %v851_v54 = vpop.f32.mrf.mxu0 }
 0x2b4   :  { %v865_v55 = vadd.f32 1e-18, %v851_v54 }
 0x2b6   :  { %1132 = vlog2.f32 %v865_v55 }
 0x2bb   :  { %v221_v56 = vpop.xlane.xlu1 %220 }
 0x2bc   :  { %1134 = vrcp.f32 %v221_v56 }
 0x2bf   :  { %v1131_v57 = vpop.eup %1130  ;;  %v223_v32 = vpop.xlane.xlu1 %222 }
 0x2c0   :  { %v867_v58 = vmul.f32 0.6931472, %v1131_v57  ;;  %1136 = vrcp.f32 %v223_v32 }
 0x2c2   :  { %870 = vst [vmem:[#allocation10 + $0x8] sm:$0xff] %v867_v58 }
 0x2c3   :  { %v1133_v59 = vpop.eup %1132 }
 0x2c4   :  { %v869_v60 = vmul.f32 0.6931472, %v1133_v59 }
 0x2c6   :  { %871 = vst [vmem:[#allocation10 + $0x18] sm:$0xff] %v869_v60 }
 0x2c9   :  { %v1135_v61 = vpop.eup %1134 }
 0x2ca   :  { %v225_v62 = vmul.f32 %v1135_v61, %v1558_v26 }
 0x2cc   :  { %230 = vperm.xlu1 %1109, %v225_v62  }
 0x2cd   :  { %v1137_v63 = vpop.eup %1136 }
 0x2ce   :  { %v227_v1 = vmul.f32 %v1137_v63, %v1565_v34 }
 0x2d0   :  { %235 = vperm.xlu0 %1108, %v227_v1  }
 0x347   :  { %v231_v2 = vpop.permute.xlu1 %230 }
 0x348   :  { %v238_v3 = vmul.f32 %v1127_v21, %v231_v2 }
 0x34a   :  { %v854_v4 = vadd.f32 %v679_v51, %v238_v3 }
 0x34b   :  { %v236_v5 = vpop.permute.xlu0 %235 }
 0x34c   :  { %v856_v6 = vadd.f32 1e-18, %v854_v4  ;;  %v239_v7 = vmul.f32 %v1129_v50, %v236_v5 }
 0x34e   :  { %1138 = vlog2.f32 %v856_v6  ;;  %v855_v8 = vadd.f32 %v849_v53, %v239_v7 }
 0x350   :  { %v857_v9 = vadd.f32 1e-18, %v855_v8 }
 0x352   :  { %1140 = vlog2.f32 %v857_v9 }
 0x35b   :  { %v1139_v10 = vpop.eup %1138 }
 0x35c   :  { %v859_v11 = vmul.f32 0.6931472, %v1139_v10 }
 0x35e   :  { %862 = vst [vmem:[#allocation10] sm:$0xff] %v859_v11 }
 0x35f   :  { %v1141_v12 = vpop.eup %1140 }
 0x360   :  { %v861_v13 = vmul.f32 0.6931472, %v1141_v12 }
 0x362   :  { %863 = vst [vmem:[#allocation10 + $0x10] sm:$0xff] %v861_v13 }
 0x363   :  { %1233 = shalt.err (!%p1230_p10)
}
 0x364   :  { %883 = dma.vmem_to_hbm [thread:$0]  %s878_s19, 512, %s1603_s5, [#allocation4], %s1258_s0, %s1258_s0, %s1259_s14  }
 0x365   :  { %1248 = dma.done.wait [#allocation4], 512  }
 0x366   :  { %1249 = vsyncadd [#allocation4], 4294966784 }
 0x367   :  { %887 = vsyncpa [#allocation3], 1 }
 0x368   :  { %888 = vsyncpa [#allocation6], 1 }
 0x369   :  { %889 = vsyncpa [#allocation9], 1 }
 0x36a   :  { %890 = vsyncpa [#allocation4], 1 }

</bundles_post_ra>
